<compile_context>
chip_gen: v5e
topology: v5e:2x2
jax: 0.10.0
libtpu: 0.0.40
codegen_flags: <defaults>
</compile_context>

<pallas_src>
import functools
import math

import jax
import jax.numpy as jnp
from jax.experimental import pallas as pl
from jax.experimental.pallas import tpu as pltpu


def _gelu_tanh(x):
    # nn.GELU(approximate='tanh'):
    #   0.5 * x * (1 + tanh(sqrt(2/pi) * (x + 0.044715 * x^3)))
    c = math.sqrt(2.0 / math.pi)
    return 0.5 * x * (1.0 + jnp.tanh(c * (x + 0.044715 * x * x * x)))


# ---------------------------------------------------------------------------
# Kernels
# ---------------------------------------------------------------------------

def _make_resident_kernel(th, n_chunks):
    """Weights fully VMEM-resident; 1-D grid over row tiles.

    x_ref: (tm, C)   wfc_ref: (C, H)   bfc_ref: (1, H)
    wproj_ref: (H, C)   bproj_ref: (1, C)
    o_ref: (tm, C)   acc_ref: (tm, C) f32 scratch
    """

    def kernel(x_ref, wfc_ref, bfc_ref, wproj_ref, bproj_ref, o_ref, acc_ref):
        # Start the accumulator at the broadcast output bias -> the finalize
        # is a pure cast + store (no extra (tm, C) VALU add in the epilogue).
        acc_ref[...] = jnp.broadcast_to(
            bproj_ref[...].astype(jnp.float32), acc_ref.shape)

        # Static unroll over th-wide hidden chunks: slice starts are
        # compile-time constants (128-aligned) and the live intermediate is
        # only (tm, th).
        for t in range(n_chunks):
            lo, hi = t * th, (t + 1) * th
            h = jnp.dot(x_ref[...], wfc_ref[:, lo:hi],
                        preferred_element_type=jnp.float32)
            h = _gelu_tanh(h + bfc_ref[:, lo:hi].astype(jnp.float32))
            # Cast back to the weight dtype so the MXU stays on its native
            # (e.g. bf16 x bf16 -> f32) path.
            acc_ref[...] += jnp.dot(h.astype(wproj_ref.dtype),
                                    wproj_ref[lo:hi, :],
                                    preferred_element_type=jnp.float32)

        o_ref[...] = acc_ref[...].astype(o_ref.dtype)

    return kernel


def _chunked_kernel(x_ref, wfc_ref, bfc_ref, wproj_ref, bproj_ref, o_ref,
                    acc_ref):
    """Fallback: 2-D grid (row tiles x H chunks); weight chunks streamed.

    x_ref: (tm, C)   wfc_ref: (C, th)   bfc_ref: (1, th)
    wproj_ref: (th, C)   bproj_ref: (1, C)
    o_ref: (tm, C)   acc_ref: (tm, C) f32 scratch
    """
    j = pl.program_id(1)

    @pl.when(j == 0)
    def _():
        acc_ref[...] = jnp.broadcast_to(
            bproj_ref[...].astype(jnp.float32), acc_ref.shape)

    h = jnp.dot(x_ref[...], wfc_ref[...], preferred_element_type=jnp.float32)
    h = _gelu_tanh(h + bfc_ref[...].astype(jnp.float32))
    acc_ref[...] += jnp.dot(h.astype(wproj_ref.dtype), wproj_ref[...],
                            preferred_element_type=jnp.float32)

    @pl.when(j == pl.num_programs(1) - 1)
    def _():
        o_ref[...] = acc_ref[...].astype(o_ref.dtype)


# ---------------------------------------------------------------------------
# Host-side wrapper
# ---------------------------------------------------------------------------

def _round_up(n, m):
    return ((n + m - 1) // m) * m


def _pick_tile(n, target, aligns):
    """Largest tile <= min(target, n), aligned to one of `aligns` (tried in
    order, most-preferred first), that divides n exactly; if none divides,
    return the largest aligned tile (the caller zero-pads n up to it)."""
    cap = min(target, n)
    for a in aligns:
        t = (cap // a) * a
        while t >= a:
            if n % t == 0:
                return t
            t -= a
    a = aligns[-1]
    return max(a, (cap // a) * a)


def _vmem_budget_bytes():
    try:
        cap = pltpu.get_tpu_info().vmem_capacity_bytes
    except Exception:
        cap = 64 << 20  # be conservative: v7x has 64 MiB per TensorCore
    return int(cap * 0.75)


def mlp_forward(x, w_fc, b_fc, w_proj, b_proj, *, tm=512, th=512,
                force_chunked=False):
    """Fused GPT-2 MLP: GELU_tanh(x @ W_fc + b_fc) @ W_proj + b_proj.

    x: (B, T, C); w_fc: (C, H); b_fc: (H,); w_proj: (H, C); b_proj: (C,).
    Weights are stored (in_features, out_features), i.e. the transpose of
    PyTorch's nn.Linear.weight, so the kernel computes x @ W + b.
    For best MXU throughput pass x / weights in bfloat16 (the accumulator,
    biases and GELU still run in float32).
    """
    B, T, C = x.shape
    H = w_fc.shape[1]
    M = B * T

    out_dtype = x.dtype
    xb = jnp.dtype(x.dtype).itemsize
    ob = jnp.dtype(out_dtype).itemsize
    wb = jnp.dtype(w_fc.dtype).itemsize
    bb = jnp.dtype(b_fc.dtype).itemsize

    # Row tiles: prefer 256-multiples (full v6e/v7x MXU tiles), then 16
    # (bf16 sublane packing), then 8.  Hidden chunks: 128-lane multiples.
    tm = _pick_tile(M, tm, (256, 16, 8))
    th = _pick_tile(H, th, (128,))

    M_pad = _round_up(M, tm)
    # Keep >= 2 row tiles when M allows it so the 'parallel' axis can shard
    # across both TensorCores on v7x.
    if M_pad // tm < 2 and tm >= 512 and tm % 2 == 0:
        tm //= 2
        M_pad = _round_up(M, tm)
    H_pad = _round_up(H, th)
    n_row = M_pad // tm
    n_h = H_pad // th

    x2d = x.reshape(M, C)
    if M_pad != M:
        x2d = jnp.pad(x2d, ((0, M_pad - M), (0, 0)))
    if H_pad != H:
        # Zero-padded hidden units contribute exactly 0 (GELU(0) = 0 and the
        # padded W_proj rows are zero), so the math is unchanged.
        w_fc = jnp.pad(w_fc, ((0, 0), (0, H_pad - H)))
        b_fc = jnp.pad(b_fc, ((0, H_pad - H),))
        w_proj = jnp.pad(w_proj, ((0, H_pad - H), (0, 0)))

    b_fc2d = b_fc.reshape(1, H_pad)
    b_proj2d = b_proj.reshape(1, C)

    budget = _vmem_budget_bytes()

    weight_bytes = 2 * C * H_pad * wb + (H_pad + C) * bb
    io_tile_bytes = 2 * tm * C * xb + 2 * tm * C * ob      # double-buffered x/out
    acc_bytes = tm * C * 4
    inner_bytes = tm * th * (4 + wb)   # f32 hidden chunk + its weight-dtype copy
    resident_need = (2 * weight_bytes + io_tile_bytes + acc_bytes
                     + inner_bytes + (2 << 20))
    use_resident = (not force_chunked) and resident_need <= budget

    flops = 4 * M_pad * C * H_pad       # two matmuls
    transcendentals = M_pad * H_pad     # one tanh per hidden activation

    if use_resident:
        # Weights are DMA'd exactly once (constant index maps); only the x/out
        # row tiles stream per grid step.
        grid_spec = pltpu.PrefetchScalarGridSpec(
            num_scalar_prefetch=0,
            grid=(n_row,),
            in_specs=[
                pl.BlockSpec((tm, C), lambda i: (i, 0)),       # x row tile
                pl.BlockSpec((C, H_pad), lambda i: (0, 0)),    # W_fc (resident)
                pl.BlockSpec((1, H_pad), lambda i: (0, 0)),    # b_fc
                pl.BlockSpec((H_pad, C), lambda i: (0, 0)),    # W_proj (resident)
                pl.BlockSpec((1, C), lambda i: (0, 0)),        # b_proj
            ],
            out_specs=pl.BlockSpec((tm, C), lambda i: (i, 0)),
            scratch_shapes=[pltpu.VMEM((tm, C), jnp.float32)],
        )
        kernel = _make_resident_kernel(th, n_h)
        dim_sems = ("parallel",)
        vmem_need = resident_need
        bytes_accessed = 2 * M_pad * C * xb + weight_bytes
    else:
        # H-chunked fallback (weights exceed the VMEM budget, e.g. GPT-2 XL on
        # v7x).  Weight chunks are re-streamed once per row tile, so tm stays
        # large to amortize that traffic, and the chunks get 3-deep prefetch.
        # TODO(synk): storing W_fc pre-transposed as (H, C) would make its
        # per-chunk DMA contiguous instead of a strided column slice.
        wbuf = 3 if n_h >= 3 else 2
        if n_h >= 3:
            wfc_spec = pl.BlockSpec((C, th), lambda i, j: (0, j),
                                    pipeline_mode=pl.Buffered(3))
            wproj_spec = pl.BlockSpec((th, C), lambda i, j: (j, 0),
                                      pipeline_mode=pl.Buffered(3))
        else:
            wfc_spec = pl.BlockSpec((C, th), lambda i, j: (0, j))
            wproj_spec = pl.BlockSpec((th, C), lambda i, j: (j, 0))

        grid_spec = pltpu.PrefetchScalarGridSpec(
            num_scalar_prefetch=0,
            grid=(n_row, n_h),
            in_specs=[
                pl.BlockSpec((tm, C), lambda i, j: (i, 0)),    # x row tile
                wfc_spec,                                      # W_fc H-chunk
                pl.BlockSpec((1, th), lambda i, j: (0, j)),    # b_fc H-chunk
                wproj_spec,                                    # W_proj H-chunk
                pl.BlockSpec((1, C), lambda i, j: (0, 0)),     # b_proj
            ],
            out_specs=pl.BlockSpec((tm, C), lambda i, j: (i, 0)),
            scratch_shapes=[pltpu.VMEM((tm, C), jnp.float32)],
        )
        kernel = _chunked_kernel
        dim_sems = ("parallel", "arbitrary")
        vmem_need = (io_tile_bytes + acc_bytes + inner_bytes
                     + wbuf * 2 * C * th * wb
                     + 2 * (th + C) * bb + (2 << 20))
        bytes_accessed = 2 * M_pad * C * xb + n_row * weight_bytes

    vmem_limit = min(budget, int(vmem_need * 1.25) + (8 << 20))

    cost = pl.CostEstimate(flops=flops, transcendentals=transcendentals,
                           bytes_accessed=bytes_accessed)

    out2d = pl.pallas_call(
        kernel,
        out_shape=jax.ShapeDtypeStruct((M_pad, C), out_dtype),
        grid_spec=grid_spec,
        compiler_params=pltpu.CompilerParams(
            dimension_semantics=dim_sems,
            vmem_limit_bytes=vmem_limit),
        cost_estimate=cost,
    )(x2d, w_fc, b_fc2d, w_proj, b_proj2d)

    if M_pad != M:
        out2d = out2d[:M]
    return out2d.reshape(B, T, C)


if __name__ == "__main__":
    # Small, forward-consistent shapes: batch=2, seq=8, n_embd=32 (hidden=128).
    # (At GPT-2 scale C=768/H=3072 the wrapper picks tm=512, th=512 and the
    # weight-resident path; forced-chunked mirrors the huge-model fallback.)
    B, T, C = 2, 8, 32
    H = 4 * C

    key = jax.random.PRNGKey(0)
    kx, k1, k2, k3, k4 = jax.random.split(key, 5)

    x = jax.random.normal(kx, (B, T, C), dtype=jnp.float32)
    w_fc = jax.random.normal(k1, (C, H), dtype=jnp.float32) * (1.0 / math.sqrt(C))
    b_fc = jax.random.normal(k2, (H,), dtype=jnp.float32) * 0.01
    w_proj = jax.random.normal(k3, (H, C), dtype=jnp.float32) * (1.0 / math.sqrt(H))
    b_proj = jax.random.normal(k4, (C,), dtype=jnp.float32) * 0.01

    # Pure-JAX reference (same math as the PyTorch module).
    ref = (_gelu_tanh(x.reshape(-1, C) @ w_fc + b_fc) @ w_proj + b_proj)
    ref = ref.reshape(B, T, C)

    # 1) f32, weight-resident path (tight tolerance).
    out_f32 = jax.block_until_ready(mlp_forward(x, w_fc, b_fc, w_proj, b_proj))
    assert jnp.allclose(out_f32, ref, atol=1e-4, rtol=1e-4), "f32 mismatch"

    # 2) bf16 fast path (native MXU dtype; f32 accumulation inside the kernel).
    bf = jnp.bfloat16
    out_bf16 = jax.block_until_ready(
        mlp_forward(x.astype(bf), w_fc.astype(bf), b_fc.astype(bf),
                    w_proj.astype(bf), b_proj.astype(bf)))
    assert jnp.allclose(out_bf16.astype(jnp.float32), ref,
                        atol=1e-1, rtol=1e-1), "bf16 mismatch"

    # 3) Forced H-chunked fallback path (what runs when weights exceed VMEM).
    out_chunk = jax.block_until_ready(
        mlp_forward(x, w_fc, b_fc, w_proj, b_proj, force_chunked=True))
    assert jnp.allclose(out_chunk, ref, atol=1e-4, rtol=1e-4), "chunked mismatch"

    print("KERNEL_OK")
</pallas_src>

<mosaic_0001>
module attributes {stable_mosaic.version = 11 : i64} {
  func.func @kernel(%arg0: i32, %arg1: memref<16x32xf32, #tpu.memory_space<vmem>>, %arg2: memref<32x128xf32, #tpu.memory_space<vmem>>, %arg3: memref<1x128xf32, #tpu.memory_space<vmem>>, %arg4: memref<128x32xf32, #tpu.memory_space<vmem>>, %arg5: memref<1x32xf32, #tpu.memory_space<vmem>>, %arg6: memref<16x32xf32, #tpu.memory_space<vmem>>, %arg7: memref<16x32xf32, #tpu.memory_space<vmem>>) attributes {dimension_semantics = [#tpu.dimension_semantics<parallel>], iteration_bounds = array<i64: 1>, scalar_prefetch = 0 : i64, scratch_operands = 1 : i64, tpu.core_type = #tpu.core_type<tc>, window_params = [{transform_indices = @transform_0, window_bounds = array<i64: 16, 32>}, {pipeline_mode = #tpu.pipeline_mode<synchronous>, transform_indices = @transform_1, window_bounds = array<i64: 32, 128>}, {pipeline_mode = #tpu.pipeline_mode<synchronous>, transform_indices = @transform_2, window_bounds = array<i64: 1, 128>}, {pipeline_mode = #tpu.pipeline_mode<synchronous>, transform_indices = @transform_3, window_bounds = array<i64: 128, 32>}, {pipeline_mode = #tpu.pipeline_mode<synchronous>, transform_indices = @transform_4, window_bounds = array<i64: 1, 32>}, {transform_indices = @transform_5, window_bounds = array<i64: 16, 32>}]} {
    %c0 = arith.constant 0 : index
    %c0_0 = arith.constant 0 : index
    %0 = vector.load %arg5[%c0, %c0_0] : memref<1x32xf32, #tpu.memory_space<vmem>>, vector<1x32xf32>
    %1 = vector.shape_cast %0 : vector<1x32xf32> to vector<1x32xf32>
    %2 = vector.broadcast %1 : vector<1x32xf32> to vector<16x32xf32>
    %c0_1 = arith.constant 0 : index
    %c0_2 = arith.constant 0 : index
    %3 = vector.load %arg7[%c0_1, %c0_2] : memref<16x32xf32, #tpu.memory_space<vmem>>, vector<16x32xf32>
    tpu.vector_store %arg7[%c0_1, %c0_2], %2 {strides = array<i32>} : memref<16x32xf32, #tpu.memory_space<vmem>>, vector<16x32xf32>,
    %c0_3 = arith.constant 0 : index
    %c0_4 = arith.constant 0 : index
    %4 = vector.load %arg1[%c0_3, %c0_4] : memref<16x32xf32, #tpu.memory_space<vmem>>, vector<16x32xf32>
    %c0_5 = arith.constant 0 : index
    %c0_6 = arith.constant 0 : index
    %5 = vector.load %arg2[%c0_5, %c0_6] : memref<32x128xf32, #tpu.memory_space<vmem>>, vector<32x128xf32>
    %cst = arith.constant dense<0.000000e+00> : vector<16x128xf32>
    %6 = tpu.matmul %4, %5, %cst {dimension_numbers = #tpu.dot_dimension_numbers<[1], [0], [0], [1], [0, 0, 1, 1], [], []>} : vector<16x32xf32>, vector<32x128xf32>, vector<16x128xf32> -> vector<16x128xf32>
    %c0_7 = arith.constant 0 : index
    %c0_8 = arith.constant 0 : index
    %7 = vector.load %arg3[%c0_7, %c0_8] : memref<1x128xf32, #tpu.memory_space<vmem>>, vector<1x128xf32>
    %8 = vector.broadcast %7 : vector<1x128xf32> to vector<16x128xf32>
    %9 = arith.addf %6, %8 : vector<16x128xf32>
    %cst_9 = arith.constant 5.000000e-01 : f32
    %10 = vector.broadcast %cst_9 : f32 to vector<16x128xf32>
    %11 = arith.mulf %10, %9 : vector<16x128xf32>
    %cst_10 = arith.constant 4.471500e-02 : f32
    %12 = vector.broadcast %cst_10 : f32 to vector<16x128xf32>
    %13 = arith.mulf %12, %9 : vector<16x128xf32>
    %14 = arith.mulf %13, %9 : vector<16x128xf32>
    %15 = arith.mulf %14, %9 : vector<16x128xf32>
    %16 = arith.addf %9, %15 : vector<16x128xf32>
    %cst_11 = arith.constant 0.797884583 : f32
    %17 = vector.broadcast %cst_11 : f32 to vector<16x128xf32>
    %18 = arith.mulf %17, %16 : vector<16x128xf32>
    %19 = math.tanh %18 : vector<16x128xf32>
    %cst_12 = arith.constant 1.000000e+00 : f32
    %20 = vector.broadcast %cst_12 : f32 to vector<16x128xf32>
    %21 = arith.addf %20, %19 : vector<16x128xf32>
    %22 = arith.mulf %11, %21 : vector<16x128xf32>
    %c0_13 = arith.constant 0 : index
    %c0_14 = arith.constant 0 : index
    %23 = vector.load %arg7[%c0_13, %c0_14] : memref<16x32xf32, #tpu.memory_space<vmem>>, vector<16x32xf32>
    %c0_15 = arith.constant 0 : index
    %c0_16 = arith.constant 0 : index
    %24 = vector.load %arg4[%c0_15, %c0_16] : memref<128x32xf32, #tpu.memory_space<vmem>>, vector<128x32xf32>
    %cst_17 = arith.constant dense<0.000000e+00> : vector<16x32xf32>
    %25 = tpu.matmul %22, %24, %cst_17 {dimension_numbers = #tpu.dot_dimension_numbers<[1], [0], [0], [1], [0, 0, 1, 1], [], []>} : vector<16x128xf32>, vector<128x32xf32>, vector<16x32xf32> -> vector<16x32xf32>
    %26 = arith.addf %23, %25 : vector<16x32xf32>
    %c0_18 = arith.constant 0 : index
    %c0_19 = arith.constant 0 : index
    %27 = vector.load %arg7[%c0_18, %c0_19] : memref<16x32xf32, #tpu.memory_space<vmem>>, vector<16x32xf32>
    tpu.vector_store %arg7[%c0_18, %c0_19], %26 {strides = array<i32>} : memref<16x32xf32, #tpu.memory_space<vmem>>, vector<16x32xf32>,
    %c0_20 = arith.constant 0 : index
    %c0_21 = arith.constant 0 : index
    %28 = vector.load %arg7[%c0_20, %c0_21] : memref<16x32xf32, #tpu.memory_space<vmem>>, vector<16x32xf32>
    %c0_22 = arith.constant 0 : index
    %c0_23 = arith.constant 0 : index
    %29 = vector.load %arg6[%c0_22, %c0_23] : memref<16x32xf32, #tpu.memory_space<vmem>>, vector<16x32xf32>
    tpu.vector_store %arg6[%c0_22, %c0_23], %28 {strides = array<i32>} : memref<16x32xf32, #tpu.memory_space<vmem>>, vector<16x32xf32>,
    return
  }
  func.func @transform_0(%arg0: i32) -> (i32, i32) {
    %c0_i32 = arith.constant 0 : i32
    %c0_i32_0 = arith.constant 0 : i32
    return %arg0, %c0_i32 : i32, i32
  }
  func.func @transform_1(%arg0: i32) -> (i32, i32) {
    %c0_i32 = arith.constant 0 : i32
    %c0_i32_0 = arith.constant 0 : i32
    %c0_i32_1 = arith.constant 0 : i32
    return %c0_i32, %c0_i32_0 : i32, i32
  }
  func.func @transform_2(%arg0: i32) -> (i32, i32) {
    %c0_i32 = arith.constant 0 : i32
    %c0_i32_0 = arith.constant 0 : i32
    %c0_i32_1 = arith.constant 0 : i32
    return %c0_i32, %c0_i32_0 : i32, i32
  }
  func.func @transform_3(%arg0: i32) -> (i32, i32) {
    %c0_i32 = arith.constant 0 : i32
    %c0_i32_0 = arith.constant 0 : i32
    %c0_i32_1 = arith.constant 0 : i32
    return %c0_i32, %c0_i32_0 : i32, i32
  }
  func.func @transform_4(%arg0: i32) -> (i32, i32) {
    %c0_i32 = arith.constant 0 : i32
    %c0_i32_0 = arith.constant 0 : i32
    %c0_i32_1 = arith.constant 0 : i32
    return %c0_i32, %c0_i32_0 : i32, i32
  }
  func.func @transform_5(%arg0: i32) -> (i32, i32) {
    %c0_i32 = arith.constant 0 : i32
    %c0_i32_0 = arith.constant 0 : i32
    return %arg0, %c0_i32 : i32, i32
  }
}

</mosaic_0001>

<bundles_post_ra>
// kernel: tpu_custom_call.1
= control target key start
LH: loop header
LB: loop body
LE: loop exit
PB: predicated region body
PF: predicated region fallthrough
CT: control target
= control target key end

     0   :  { %s321_s0 = inlined_call_operand.vmem [shape: f32[16,32], index: 0, kind: input, shape index: {}]   ;;  %s322_s1 = inlined_call_operand.vmem [shape: f32[32,128], index: 1, kind: input, shape index: {}]   ;;  %s323_s2 = inlined_call_operand.vmem [shape: f32[1,128], index: 2, kind: input, shape index: {}]   ;;  %s324_s3 = inlined_call_operand.vmem [shape: f32[128,32], index: 3, kind: input, shape index: {}]   ;;  %s325_s4 = inlined_call_operand.vmem [shape: f32[1,32], index: 4, kind: input, shape index: {}]   ;;  %s326_s5 = inlined_call_operand.hbm [shape: f32[16,32], index: 5, kind: output, shape index: {}]  }
   0x1   :  { %v33_v0 = vld [vmem:[%s322_s1 + $0x18] sm:$0xff]  ;;  %v32_v1 = vld [vmem:[%s322_s1 + $0x10] sm:$0xff]  ;;  %v31_v2 = vld [vmem:[%s322_s1 + $0x8] sm:$0xff] }
   0x2   :  { %56 = vmatpush.msra.mxu0 %v33_v0  ;;  %v102_v3 = vld [vmem:[%s324_s3 + $0x78] sm:$0xff]  ;;  %v101_v4 = vld [vmem:[%s324_s3 + $0x70] sm:$0xff]  ;;  %v30_v5 = vld [vmem:[%s322_s1] sm:$0xff] }
   0x3   :  { %103 = vmatpush.msra.mxu1 %v102_v3  ;;  %v100_v6 = vld [vmem:[%s324_s3 + $0x68] sm:$0xff]  ;;  %154 = vmatpush.msra.mxu2 %v102_v3 }
   0x4   :  { %57 = vmatpush.msra.mxu0 %v32_v1 }
   0x5   :  { %10 = vsyncpa [#allocation4], 0  ;;  %vm25_vm0 = vcmask 261120   ;;  %v28_v7 = vld [vmem:[%s321_s0] sm:$0xff]  ;;  %104 = vmatpush.msra.mxu1 %v101_v4  ;;  %155 = vmatpush.msra.mxu2 %v101_v4  ;;  %v29_v9 = vld [vmem:[%s321_s0 + $0x8] sm:$0xff]  ;;  %s140_s14 = sshll.u32 %s326_s5, 4  ;;  %s141_s14 = int_to_ptr.hbm [resolvable:$true] %s140_s14 }
   0x6   :  { %58 = vmatpush.msra.mxu0 %v31_v2  ;;  %v99_v8 = vld [vmem:[%s324_s3 + $0x60] sm:$0xff]  ;;  %v98_v10 = vld [vmem:[%s324_s3 + $0x58] sm:$0xff]  ;;  %v97_v11 = vld [vmem:[%s324_s3 + $0x50] sm:$0xff]  ;;  %s206_s15 = smov 128   ;;  %s207_s16 = smov 8  }
   0x7   :  { %105 = vmatpush.msra.mxu1 %v100_v6  ;;  %156 = vmatpush.msra.mxu2 %v100_v6  ;;  %v96_v12 = vld [vmem:[%s324_s3 + $0x48] sm:$0xff]  ;;  %v95_v13 = vld [vmem:[%s324_s3 + $0x40] sm:$0xff]  ;;  %v94_v14 = vld [vmem:[%s324_s3 + $0x38] sm:$0xff] }
   0x8   :  { %59 = vmatpush.msra.mxu0 %v30_v5  ;;  %v93_v15 = vld [vmem:[%s324_s3 + $0x30] sm:$0xff]  ;;  %v92_v16 = vld [vmem:[%s324_s3 + $0x28] sm:$0xff]  ;;  %v91_v17 = vld [vmem:[%s324_s3 + $0x20] sm:$0xff] }
   0x9   :  { %152 = vmatmul.msk.f32.vlgmr.msra.gmra.mxu0 %vm25_vm0, %v28_v7  ;;  %106 = vmatpush.msra.mxu1 %v99_v8  ;;  %v90_v18 = vld [vmem:[%s324_s3 + $0x18] sm:$0xff]  ;;  %v89_v19 = vld [vmem:[%s324_s3 + $0x10] sm:$0xff]  ;;  %v88_v20 = vld [vmem:[%s324_s3 + $0x8] sm:$0xff] }
   0xa   :  { %157 = vmatpush.msra.mxu2 %v99_v8  ;;  %v87_v21 = vld [vmem:[%s324_s3] sm:$0xff] }
   0xb   :  { %107 = vmatpush.msra.mxu1 %v98_v10  ;;  %v173_v22 = vld [vmem:[%s323_s2] ss:$0 sm:$0xff]  ;;  %s205_s2 = smov [#allocation3]  }
   0xc   :  { %158 = vmatpush.msra.mxu2 %v98_v10  ;;  %v174_v24 = vld [vmem:[%s325_s4] ss:$0 sm:$0xff]  ;;  %s138_s3 = sshll.u32 %s205_s2, 4  ;;  %s139_s3 = int_to_ptr.vmem [resolvable:$true] %s138_s3 }
   0xd   :  { %108 = vmatpush.msra.mxu1 %v97_v11  ;;  %26 = vst.msk [vmem:[#allocation2] sm:$0xff] %vm25_vm0, %v174_v24 }
   0xe   :  { %159 = vmatpush.msra.mxu2 %v97_v11  ;;  %27 = vst.msk [vmem:[#allocation2 + $0x8] sm:$0xff] %vm25_vm0, %v174_v24 }
   0xf   :  { %109 = vmatpush.msra.mxu1 %v96_v12 }
  0x10   :  { %160 = vmatpush.msra.mxu2 %v96_v12 }
  0x11   :  { %153 = vmatmul.msk.f32.gmra.mxu0 %vm25_vm0, %v29_v9  ;;  %110 = vmatpush.msra.mxu1 %v95_v13 }
  0x12   :  { %161 = vmatpush.msra.mxu2 %v95_v13 }
  0x13   :  { %111 = vmatpush.msra.mxu1 %v94_v14 }
  0x14   :  { %162 = vmatpush.msra.mxu2 %v94_v14  ;;  %v85_v46 = vld [vmem:[#allocation2] sm:$0xff] }
  0x15   :  { %112 = vmatpush.msra.mxu1 %v93_v15  ;;  %v86_v50 = vld [vmem:[#allocation2 + $0x8] sm:$0xff] }
  0x16   :  { %163 = vmatpush.msra.mxu2 %v93_v15 }
  0x17   :  { %113 = vmatpush.msra.mxu1 %v92_v16 }
  0x18   :  { %164 = vmatpush.msra.mxu2 %v92_v16 }
  0x19   :  { %114 = vmatpush.msra.mxu1 %v91_v17 }
  0x1a   :  { %165 = vmatpush.msra.mxu2 %v91_v17 }
  0x1b   :  { %115 = vmatpush.msra.mxu1 %v90_v18 }
  0x1c   :  { %166 = vmatpush.msra.mxu2 %v90_v18 }
  0x1d   :  { %116 = vmatpush.msra.mxu1 %v89_v19 }
  0x1e   :  { %167 = vmatpush.msra.mxu2 %v89_v19 }
  0x1f   :  { %117 = vmatpush.msra.mxu1 %v88_v20 }
  0x20   :  { %168 = vmatpush.msra.mxu2 %v88_v20 }
  0x21   :  { %118 = vmatpush.msra.mxu1 %v87_v21 }
  0x22   :  { %169 = vmatpush.msra.mxu2 %v87_v21 }
  0x86   :  { %v61_v23 = vpop.f32.mrf.mxu0 }
  0x87   :  { %v62_v25 = vadd.f32 %v173_v22, %v61_v23 }
  0x89   :  { %v69_v26 = vmul.f32 0.044715, %v62_v25  ;;  %v67_v39 = vmul.f32 0.5, %v62_v25 }
  0x8b   :  { %v71_v27 = vmul.f32 %v69_v26, %v62_v25 }
  0x8d   :  { %v73_v28 = vmul.f32 %v71_v27, %v62_v25 }
  0x8e   :  { %v64_v29 = vpop.f32.mrf.mxu0 }
  0x8f   :  { %v65_v30 = vadd.f32 %v173_v22, %v64_v29  ;;  %v75_v31 = vadd.f32 %v73_v28, %v62_v25 }
  0x91   :  { %v77_v32 = vmul.f32 0.7978846, %v75_v31  ;;  %v70_v33 = vmul.f32 0.044715, %v65_v30  ;;  %v68_v43 = vmul.f32 0.5, %v65_v30 }
  0x93   :  { %175 = vtanh.f32 %v77_v32  ;;  %v72_v34 = vmul.f32 %v70_v33, %v65_v30 }
  0x95   :  { %v74_v35 = vmul.f32 %v72_v34, %v65_v30 }
  0x97   :  { %v76_v36 = vadd.f32 %v74_v35, %v65_v30 }
  0x99   :  { %v176_v37 = vpop.eup %175  ;;  %v78_v38 = vmul.f32 0.7978846, %v76_v36 }
  0x9a   :  { %v81_v40 = vadd.f32 1.0, %v176_v37 }
  0x9b   :  { %177 = vtanh.f32 %v78_v38 }
  0x9c   :  { %v83_v41 = vmul.f32 %v81_v40, %v67_v39 }
  0x9e   :  { %119 = vmatmul.f32.vlgmr.msra.gmra.mxu1 %v83_v41 }
  0xa1   :  { %v178_v42 = vpop.eup %177 }
  0xa2   :  { %v82_v44 = vadd.f32 1.0, %v178_v42 }
  0xa4   :  { %v84_v45 = vmul.f32 %v82_v44, %v68_v43 }
  0xa6   :  { %122 = vmatmul.f32.vlgmr.msra.gmra.mxu2 %v84_v45 }
 0x11b   :  { %v120_v47 = vpop.f32.mrf.mxu1 }
 0x11c   :  { %v126_v48 = vadd.f32 %v120_v47, %v85_v46 }
 0x11e   :  { %128 = vst.msk [vmem:[#allocation2] sm:$0xff] %vm25_vm0, %v126_v48 }
 0x125   :  { %v130_v49 = vld [vmem:[#allocation2] sm:$0xff] }
 0x126   :  { %132 = vst.msk [vmem:[#allocation3] sm:$0xff] %vm25_vm0, %v130_v49 }
 0x129   :  { %v123_v51 = vpop.f32.mrf.mxu2 }
 0x12a   :  { %v127_v52 = vadd.f32 %v123_v51, %v86_v50 }
 0x12c   :  { %129 = vst.msk [vmem:[#allocation2 + $0x8] sm:$0xff] %vm25_vm0, %v127_v52 }
 0x133   :  { %v131_v53 = vld [vmem:[#allocation2 + $0x8] sm:$0xff] }
 0x134   :  { %133 = vst.msk [vmem:[#allocation3 + $0x8] sm:$0xff] %vm25_vm0, %v131_v53 }
 0x135   :  { %146 = dma.vmem_to_hbm [thread:$0]  %s139_s3, 256, %s141_s14, [#allocation4], %s206_s15, %s206_s15, %s207_s16  }
 0x136   :  { %203 = dma.done.wait [#allocation4], 256  }
 0x137   :  { %204 = vsyncadd [#allocation4], 4294967040 }
 0x138   :  { %151 = vsyncpa [#allocation4], 1 }

</bundles_post_ra>
